<compile_context>
chip_gen: v7x
topology: tpu7x:2x2x1
jax: 0.10.0
libtpu: 0.0.40
codegen_flags: <defaults>
</compile_context>

<pallas_src>
import functools

import jax
import jax.numpy as jnp
from jax.experimental import pallas as pl
from jax.experimental.pallas import tpu as pltpu


def _t2v_kernel(tau_ref, w_ref, b_ref, o_ref, *, n_feat, use_cos):
    # tau_ref: (tb, ts) input block (lane-dense along S)
    # w_ref, b_ref: (1, K) f32 parameter rows (w|w0, b|b0 concatenated)
    # o_ref: (tb, ts, K) output block in the final [B, S, K] layout
    tau = tau_ref[...].astype(jnp.float32)                    # (tb, ts)
    w = w_ref[...]                                             # (1, K)
    b = b_ref[...]                                             # (1, K)
    # Broadcast MAC: lin[b, s, k] = tau[b, s] * w[k] + b[k].  The small
    # (tb, ts, 1) relayout of tau is 1/K of the output volume; the K-expansion
    # itself is a lane broadcast on the VPU.
    lin = tau[:, :, None] * w[None] + b[None]                  # (tb, ts, K)
    act = jnp.cos(lin) if use_cos else jnp.sin(lin)
    # f() on the first K-1 features, identity on the last one.
    k_id = jax.lax.broadcasted_iota(jnp.int32, lin.shape, 2)   # (tb, ts, K)
    out = jnp.where(k_id < n_feat - 1, act, lin)
    o_ref[...] = out.astype(o_ref.dtype)                       # cast only at store


def _pick_tiles(B, S, K, out_itemsize, tile_bytes):
    """Choose (tb, ts) so blocks satisfy the (8, 128)/full-dim rule and the
    output tile is ~tile_bytes."""
    budget = max(1024, tile_bytes // out_itemsize)    # output elems per tile
    row = S * K                                       # output elems per batch row
    if row * 8 <= budget:
        # Cheap to take whole-S batch rows per tile.
        ts = S                                        # == full dim: always legal
        rows = budget // row                          # >= 8 here
        if rows >= B:
            tb = B
            # Keep >= 2 grid steps on non-trivial sizes so "parallel" axes can
            # be sharded across v7x's two TensorCores / megacore.
            if B >= 16 and B * row * out_itemsize > (1 << 20):
                tb = max(8, ((B + 1) // 2) // 8 * 8)
        else:
            tb = max(8, (rows // 8) * 8)              # multiple of 8: legal
    else:
        # Very long sequences: tile S in lane-aligned (multiple-of-128) chunks.
        tb = B if B <= 8 else 8                       # == B or multiple of 8
        ts = max(128, (budget // (tb * K)) // 128 * 128)
        if ts >= S:
            ts = S
    return tb, ts


def time2vec(tau, w, b, w0, b0, *, activation="cos", out_dtype=jnp.float32,
             tile_bytes=4 * 1024 * 1024):
    """Pallas Time2Vec forward.

    tau: [B, S]; w, b: [1, K-1]; w0, b0: [1, 1]  ->  [B, S, K] in `out_dtype`.
    Math is always f32; only the final store is cast.
    """
    assert activation in ("cos", "sin")
    assert tau.ndim == 2
    B, S = tau.shape
    K = w.shape[-1] + 1

    w_full = jnp.concatenate([w, w0], axis=-1).astype(jnp.float32).reshape(1, K)
    b_full = jnp.concatenate([b, b0], axis=-1).astype(jnp.float32).reshape(1, K)

    out_itemsize = jnp.dtype(out_dtype).itemsize
    tb, ts = _pick_tiles(B, S, K, out_itemsize, tile_bytes)
    grid = (pl.cdiv(B, tb), pl.cdiv(S, ts))

    kernel = functools.partial(_t2v_kernel, n_feat=K,
                               use_cos=(activation == "cos"))
    out = pl.pallas_call(
        kernel,
        out_shape=jax.ShapeDtypeStruct((B, S, K), out_dtype),
        grid_spec=pltpu.PrefetchScalarGridSpec(
            num_scalar_prefetch=0,
            grid=grid,
            in_specs=[
                pl.BlockSpec((tb, ts), lambda i, j: (i, j)),
                pl.BlockSpec((1, K), lambda i, j: (0, 0)),
                pl.BlockSpec((1, K), lambda i, j: (0, 0)),
            ],
            out_specs=pl.BlockSpec((tb, ts, K), lambda i, j: (i, j, 0)),
        ),
        compiler_params=pltpu.CompilerParams(
            dimension_semantics=("parallel", "parallel"),
            vmem_limit_bytes=32 * 1024 * 1024,   # explicit: v5e default is 16 MiB
        ),
    )(tau, w_full, b_full)
    return out


def time2vec_ref(tau, w, b, w0, b0, activation="cos"):
    f = jnp.cos if activation == "cos" else jnp.sin
    tau = tau.astype(jnp.float32)[..., None]              # [B, S, 1]
    v1 = f(jnp.matmul(tau, w) + b)                        # [B, S, K-1]
    v2 = jnp.matmul(tau, w0) + b0                         # [B, S, 1]
    return jnp.concatenate([v1, v2], axis=-1)


if __name__ == "__main__":
    key = jax.random.PRNGKey(0)

    def make_inputs(k, B, S, K):
        k_tau, k_w, k_b, k_w0, k_b0 = jax.random.split(k, 5)
        tau = jax.random.normal(k_tau, (B, S), dtype=jnp.float32)
        w = jax.random.normal(k_w, (1, K - 1), dtype=jnp.float32)
        b = jax.random.normal(k_b, (1, K - 1), dtype=jnp.float32)
        w0 = jax.random.normal(k_w0, (1, 1), dtype=jnp.float32)
        b0 = jax.random.normal(k_b0, (1, 1), dtype=jnp.float32)
        return tau, w, b, w0, b0

    # (activation, B, S, K, out_dtype, tile_bytes_override, tol)
    cases = [
        ("cos", 2, 8, 32, jnp.float32, None, 1e-4),            # primary small case
        ("sin", 2, 8, 32, jnp.float32, None, 1e-4),            # sine variant
        ("cos", 3, 7, 32, jnp.float32, None, 1e-4),            # S not a multiple of 8
        ("cos", 2, 8, 24, jnp.float32, None, 1e-4),            # K not dividing 128
        ("sin", 61, 200, 32, jnp.float32, 256 * 1024, 1e-4),   # multi-step grid over B + ragged last block
        ("cos", 2, 3000, 32, jnp.float32, 256 * 1024, 1e-4),   # long-S path: 128-aligned S tiles
        ("cos", 2, 8, 32, jnp.bfloat16, None, 5e-2),           # bf16 store, f32 math
    ]
    for idx, (act, B, S, K, dt, tbytes, tol) in enumerate(cases):
        sub = jax.random.fold_in(key, idx)
        tau, w, b, w0, b0 = make_inputs(sub, B, S, K)
        kw = {} if tbytes is None else {"tile_bytes": tbytes}
        out = jax.block_until_ready(
            time2vec(tau, w, b, w0, b0, activation=act, out_dtype=dt, **kw))
        ref = time2vec_ref(tau, w, b, w0, b0, activation=act)
        assert out.shape == (B, S, K), (act, out.shape)
        assert out.dtype == jnp.dtype(dt), (act, out.dtype)
        out_f32 = out.astype(jnp.float32)
        err = float(jnp.max(jnp.abs(out_f32 - ref)))
        assert jnp.allclose(out_f32, ref, atol=tol, rtol=tol), (act, B, S, K, err)

    print("KERNEL_OK")
</pallas_src>

<mosaic_0001>
module attributes {stable_mosaic.version = 11 : i64} {
  func.func @_t2v_kernel(%arg0: i32, %arg1: i32, %arg2: memref<2x8xf32, #tpu.memory_space<vmem>>, %arg3: memref<1x32xf32, #tpu.memory_space<vmem>>, %arg4: memref<1x32xf32, #tpu.memory_space<vmem>>, %arg5: memref<2x8x32xf32, #tpu.memory_space<vmem>>) attributes {dimension_semantics = [#tpu.dimension_semantics<parallel>, #tpu.dimension_semantics<parallel>], iteration_bounds = array<i64: 1, 1>, scalar_prefetch = 0 : i64, scratch_operands = 0 : i64, tpu.core_type = #tpu.core_type<tc>, window_params = [{transform_indices = @transform_0, window_bounds = array<i64: 2, 8>}, {pipeline_mode = #tpu.pipeline_mode<synchronous>, transform_indices = @transform_1, window_bounds = array<i64: 1, 32>}, {pipeline_mode = #tpu.pipeline_mode<synchronous>, transform_indices = @transform_2, window_bounds = array<i64: 1, 32>}, {transform_indices = @transform_3, window_bounds = array<i64: 2, 8, 32>}]} {
    %c0 = arith.constant 0 : index
    %c0_0 = arith.constant 0 : index
    %0 = vector.load %arg2[%c0, %c0_0] : memref<2x8xf32, #tpu.memory_space<vmem>>, vector<2x8xf32>
    %c0_1 = arith.constant 0 : index
    %c0_2 = arith.constant 0 : index
    %1 = vector.load %arg3[%c0_1, %c0_2] : memref<1x32xf32, #tpu.memory_space<vmem>>, vector<1x32xf32>
    %c0_3 = arith.constant 0 : index
    %c0_4 = arith.constant 0 : index
    %2 = vector.load %arg4[%c0_3, %c0_4] : memref<1x32xf32, #tpu.memory_space<vmem>>, vector<1x32xf32>
    %3 = vector.shape_cast %0 : vector<2x8xf32> to vector<2x8x1xf32>
    %4 = vector.shape_cast %1 : vector<1x32xf32> to vector<1x1x32xf32>
    %5 = vector.broadcast %3 : vector<2x8x1xf32> to vector<2x8x32xf32>
    %6 = vector.broadcast %4 : vector<1x1x32xf32> to vector<2x8x32xf32>
    %7 = arith.mulf %5, %6 : vector<2x8x32xf32>
    %8 = vector.shape_cast %2 : vector<1x32xf32> to vector<1x1x32xf32>
    %9 = vector.broadcast %8 : vector<1x1x32xf32> to vector<2x8x32xf32>
    %10 = arith.addf %7, %9 : vector<2x8x32xf32>
    %11 = math.cos %10 : vector<2x8x32xf32>
    %12 = tpu.iota {dimensions = array<i32: 2>} : vector<2x8x32xi32>
    %c31_i32 = arith.constant 31 : i32
    %13 = vector.broadcast %c31_i32 : i32 to vector<2x8x32xi32>
    %14 = arith.cmpi slt, %12, %13 : vector<2x8x32xi32>
    %15 = arith.select %14, %11, %10 : vector<2x8x32xi1>, vector<2x8x32xf32>
    %c0_5 = arith.constant 0 : index
    %c0_6 = arith.constant 0 : index
    %c0_7 = arith.constant 0 : index
    %16 = vector.load %arg5[%c0_5, %c0_6, %c0_7] : memref<2x8x32xf32, #tpu.memory_space<vmem>>, vector<2x8x32xf32>
    tpu.vector_store %arg5[%c0_5, %c0_6, %c0_7], %15 {strides = array<i32>} : memref<2x8x32xf32, #tpu.memory_space<vmem>>, vector<2x8x32xf32>,
    return
  }
  func.func @transform_0(%arg0: i32, %arg1: i32) -> (i32, i32) {
    %c0_i32 = arith.constant 0 : i32
    return %arg0, %arg1 : i32, i32
  }
  func.func @transform_1(%arg0: i32, %arg1: i32) -> (i32, i32) {
    %c0_i32 = arith.constant 0 : i32
    %c0_i32_0 = arith.constant 0 : i32
    %c0_i32_1 = arith.constant 0 : i32
    return %c0_i32, %c0_i32_0 : i32, i32
  }
  func.func @transform_2(%arg0: i32, %arg1: i32) -> (i32, i32) {
    %c0_i32 = arith.constant 0 : i32
    %c0_i32_0 = arith.constant 0 : i32
    %c0_i32_1 = arith.constant 0 : i32
    return %c0_i32, %c0_i32_0 : i32, i32
  }
  func.func @transform_3(%arg0: i32, %arg1: i32) -> (i32, i32, i32) {
    %c0_i32 = arith.constant 0 : i32
    %c0_i32_0 = arith.constant 0 : i32
    return %arg0, %arg1, %c0_i32 : i32, i32, i32
  }
}

</mosaic_0001>

<bundles_post_ra>
// kernel: tpu_custom_call.1
= control target key start
LH: loop header
LB: loop body
LE: loop exit
PB: predicated region body
PF: predicated region fallthrough
CT: control target
= control target key end

     0   :  { %8 = vsyncpa [#allocation3], 0  ;;  %s528_s0 = inlined_call_operand.hbm [shape: f32[2,8], index: 0, kind: input, shape index: {}]   ;;  %s529_s1 = inlined_call_operand.vmem [shape: f32[1,32], index: 1, kind: input, shape index: {}]   ;;  %s530_s2 = inlined_call_operand.vmem [shape: f32[1,32], index: 2, kind: input, shape index: {}]   ;;  %s531_s3 = inlined_call_operand.hbm [shape: f32[2,8,32], index: 3, kind: output, shape index: {}]  }
   0x1   :  { %9 = vsyncpa [#allocation4], 0  ;;  %s375_s12 = smov [#allocation2]   ;;  %s327_s16 = scalar_lea.hbm %s528_s0, 32 }
   0x2   :  { %s16_s13 = sshll.u32 %s375_s12, 4  ;;  %p328_p0 = scmp.ne.s32.totalorder %s528_s0, %s327_s16  ;;  %s17_s13 = int_to_ptr.vmem [resolvable:$true] %s16_s13 }
   0x3   :  { %p331_p1 = scmp.lt.u32.totalorder %s327_s16, %s528_s0 }
   0x5   :  { %p333_p2 = pnand %p331_p1, %p328_p0 }
   0x7   :  { %336 = shalt.err (!%p333_p2)
}
   0x8   :  { %s337_s21 = scalar_lea.vmem %s17_s13, 32  ;;  %p342_p4 = scmp.lt.s32.totalorder %s17_s13, %s17_s13 }
   0x9   :  { %p338_p3 = scmp.ne.s32.totalorder %s17_s13, %s337_s21  ;;  %p343_p5 = scmp.lt.s32.totalorder %s337_s21, %s337_s21 }
   0xb   :  { %p344_p6 = por %p343_p5, %p342_p4 }
   0xd   :  { %p345_p7 = pnand %p344_p6, %p338_p3 }
   0xf   :  { %348 = shalt.err (!%p345_p7)
}
  0x10   :  { %19 = dma.hbm_to_vmem [thread:$0]  %s528_s0, 32, %s17_s13, [#allocation3]  }
  0x11   :  { %371 = dma.done.wait [#allocation3], 32  }
  0x12   :  { %372 = vsyncadd [#allocation3], 4294967264  ;;  %v30_v0 = vlaneseq  ;;  %v27_v4 = vld [vmem:[#allocation2] sm:$0x3]  ;;  %v376_v31 = vmov 683565275  }
  0x13   :  { %v291_v7 = vld [vmem:[%s529_s1] ss:$0 sm:$0xff]  ;;  %v377_v35 = vmov 2475754826   ;;  %v378_v37 = vmov 2131351028  }
  0x14   :  { %v31_v1 = vshrl.u32 %v30_v0, 7  ;;  %v292_v8 = vld [vmem:[%s530_s2] ss:$0 sm:$0xff]  ;;  %v379_v39 = vmov 2102212464   ;;  %s382_s0 = smov [#allocation5]  }
  0x15   :  { %v380_v41 = vmov 920167782   ;;  %v381_v48 = vmov 1326507024   ;;  %s279_s1 = sshll.u32 %s382_s0, 4  ;;  %s280_s1 = int_to_ptr.vmem [resolvable:$true] %s279_s1 }
  0x16   :  { %v32_v2 = vsub.s32 0, %v31_v1  ;;  %v39_v3 = vsub.s32 1, %v31_v1  ;;  %s349_s2 = scalar_lea.vmem %s280_s1, 256  ;;  %p354_p9 = scmp.lt.s32.totalorder %s280_s1, %s280_s1 }
  0x17   :  { %p350_p8 = scmp.ne.s32.totalorder %s280_s1, %s349_s2  ;;  %p355_p10 = scmp.lt.s32.totalorder %s349_s2, %s349_s2 }
  0x18   :  { %v33_v5 = vrot.slane %v27_v4, %v32_v2  ;;  %v40_v6 = vrot.slane %v27_v4, %v39_v3 }
  0x19   :  { %p356_p11 = por %p355_p10, %p354_p9 }
  0x1a   :  { %35 = vbcast.lane.b32.xlu0 %v33_v5, 256 }
  0x1b   :  { %p357_p12 = pnand %p356_p11, %p350_p8 }
  0x1e   :  { %42 = vbcast.lane.b32.xlu0 %v40_v6, 256 }
  0x8c   :  { %v36_v9 = vpop.permute.xlu0 %35 }
  0x8d   :  { %v50_v10 = vmul.f32 %v291_v7, %v36_v9 }
  0x8f   :  { %v424_v11 = vadd.f32 %v292_v8, %v50_v10 }
  0x90   :  { %v43_v12 = vpop.permute.xlu0 %42 }
  0x91   :  { %v60_v13 = vand.u32 2147483647, %v424_v11  ;;  %v63_v14 = vand.u32 2139095040, %v424_v11  ;;  %v51_v15 = vmul.f32 %v291_v7, %v43_v12  ;;  %vm62_vm14 = vcmp.lt.s32.totalorder %v424_v11, 0 }
  0x93   :  { %v64_v16 = vshrl.u32 %v63_v14, 23  ;;  %v428_v17 = vadd.f32 %v292_v8, %v51_v15  ;;  %v67_v18 = vand.u32 8388607, %v60_v13  ;;  %vm480_vm15 = vcmp.le.f32.partialorder %v60_v13, 0.7853982 }
  0x95   :  { %v293_v19 = vadd.s32 4294967169, %v64_v16  ;;  %v166_v20 = vand.u32 2139095040, %v428_v17  ;;  %v68_v22 = vor.u32 8388608, %v67_v18  ;;  %v163_v24 = vand.u32 2147483647, %v428_v17 }
  0x97   :  { %v70_v21 = vadd.s32 1, %v293_v19  ;;  %v167_v23 = vshrl.u32 %v166_v20, 23  ;;  %v434_v29 = vshll.u32 %v68_v22, 8  ;;  %v170_v33 = vand.u32 8388607, %v163_v24 }
  0x99   :  { %vm71_vm0 = vcmp.gt.s32.totalorder %v70_v21, 0  ;;  %v297_v26 = vadd.s32 4294967169, %v167_v23  ;;  %v171_v63 = vor.u32 8388608, %v170_v33 }
  0x9a   :  { %v72_v25 = vsel %vm71_vm0, %v70_v21, 0  ;;  %vm165_vm0 = vcmp.lt.s32.totalorder %v428_v17, 0 }
  0x9b   :  { %v73_v27 = vshrl.u32 %v72_v25, 5  ;;  %v74_v28 = vand.u32 31, %v72_v25  ;;  %v173_v34 = vadd.s32 1, %v297_v26  ;;  %v211_v15 = vshll.u32 %v171_v63, 8 }
  0x9d   :  { %v75_v30 = vsub.s32 32, %v74_v28  ;;  %v77_v32 = vshll.u32 %v376_v31, %v74_v28  ;;  %v80_v36 = vshll.u32 %v377_v35, %v74_v28  ;;  %v83_v38 = vshll.u32 %v378_v37, %v74_v28 }
  0x9e   :  { %v86_v40 = vshll.u32 %v379_v39, %v74_v28  ;;  %v89_v42 = vshll.u32 %v380_v41, %v74_v28  ;;  %vm92_vm1 = vcmp.lt.s32.totalorder %v73_v27, 1  ;;  %vm94_vm2 = vcmp.lt.s32.totalorder %v73_v27, 3 }
  0x9f   :  { %v78_v43 = vshrl.u32 %v377_v35, %v75_v30  ;;  %v81_v44 = vshrl.u32 %v378_v37, %v75_v30  ;;  %v84_v45 = vshrl.u32 %v379_v39, %v75_v30  ;;  %v76_v46 = vshrl.u32 %v376_v31, %v75_v30 }
  0xa0   :  { %v87_v47 = vshrl.u32 %v380_v41, %v75_v30  ;;  %v90_v49 = vshrl.u32 %v381_v48, %v75_v30  ;;  %vm174_vm3 = vcmp.gt.s32.totalorder %v173_v34, 0  ;;  %vm95_vm4 = vcmp.lt.s32.totalorder %v73_v27, 4 }
  0xa1   :  { %v79_v50 = vor.u32 %v78_v43, %v77_v32  ;;  %v82_v51 = vor.u32 %v81_v44, %v80_v36  ;;  %v85_v52 = vor.u32 %v84_v45, %v83_v38  ;;  %v175_v55 = vsel %vm174_vm3, %v173_v34, 0 }
  0xa2   :  { %v88_v53 = vor.u32 %v87_v47, %v86_v40  ;;  %v91_v54 = vor.u32 %v90_v49, %v89_v42  ;;  %vm93_vm5 = vcmp.lt.s32.totalorder %v73_v27, 2  ;;  %v177_v3 = vand.u32 31, %v175_v55 }
  0xa3   :  { %v96_v56 = vsel %vm92_vm1, %v76_v46, %v79_v50  ;;  %v97_v57 = vsel %vm95_vm4, %v85_v52, 2102212464  ;;  %v100_v58 = vsel %vm92_vm1, %v79_v50, %v82_v51  ;;  %v104_v59 = vsel %vm92_vm1, %v82_v51, %v85_v52 }
  0xa4   :  { %v98_v60 = vsel %vm94_vm2, %v82_v51, %v97_v57  ;;  %v101_v61 = vsel %vm95_vm4, %v88_v53, 920167782  ;;  %v105_v62 = vsel %vm95_vm4, %v91_v54, 1326507024  ;;  %v176_v12 = vshrl.u32 %v175_v55, 5 }
  0xa5   :  { %v102_v1 = vsel %vm94_vm2, %v85_v52, %v101_v61  ;;  %v106_v2 = vsel %vm94_vm2, %v88_v53, %v105_v62  ;;  %v99_v4 = vsel %vm93_vm5, %v96_v56, %v98_v60  ;;  %v178_v14 = vsub.s32 32, %v177_v3 }
  0xa6   :  { %v103_v5 = vsel %vm93_vm5, %v100_v58, %v102_v1  ;;  %v107_v6 = vsel %vm93_vm5, %v104_v59, %v106_v2  ;;  %v115_v16 = vmul.u32 %v434_v29, %v99_v4  ;;  %v180_v18 = vshll.u32 %v376_v31, %v177_v3 }
  0xa7   :  { %v447_v7 = vmul.u32.u64.low %v434_v29, %v107_v6  ;;  %v448_v8 = vmul.u32.u64.high %v434_v29, %v107_v6, %v447_v7  ;;  %v451_v9 = vmul.u32.u64.low %v434_v29, %v103_v5  ;;  %v452_v10 = vmul.u32.u64.high %v434_v29, %v103_v5, %v451_v9 }
  0xa8   :  { %v183_v19 = vshll.u32 %v377_v35, %v177_v3  ;;  %v186_v20 = vshll.u32 %v378_v37, %v177_v3  ;;  %v181_v21 = vshrl.u32 %v377_v35, %v178_v14  ;;  %v184_v22 = vshrl.u32 %v378_v37, %v178_v14 }
  0xa9   :  { %v187_v23 = vshrl.u32 %v379_v39, %v178_v14  ;;  %v189_v25 = vshll.u32 %v379_v39, %v177_v3  ;;  %vm117_vm6 = vc.u32 %v448_v8, %v451_v9  ;;  %v118_v26 = vadd.s32 1, %v452_v10 }
  0xaa   :  { %v190_v27 = vshrl.u32 %v380_v41, %v178_v14  ;;  %v192_v28 = vshll.u32 %v380_v41, %v177_v3  ;;  %v182_v30 = vor.u32 %v181_v21, %v180_v18  ;;  %v185_v32 = vor.u32 %v184_v22, %v183_v19 }
  0xab   :  { %v188_v33 = vor.u32 %v187_v23, %v186_v20  ;;  %v193_v34 = vshrl.u32 %v381_v48, %v178_v14  ;;  %v119_v29 = vsel %vm117_vm6, %v118_v26, %v452_v10  ;;  %vm195_vm7 = vcmp.lt.s32.totalorder %v176_v12, 1 }
  0xac   :  { %v191_v36 = vor.u32 %v190_v27, %v189_v25  ;;  %vm198_vm8 = vcmp.lt.s32.totalorder %v176_v12, 4  ;;  %v120_v35 = vadd.s32 %v119_v29, %v115_v16  ;;  %vm197_vm9 = vcmp.lt.s32.totalorder %v176_v12, 3 }
  0xad   :  { %v194_v37 = vor.u32 %v193_v34, %v192_v28  ;;  %v200_v38 = vsel %vm198_vm8, %v188_v33, 2102212464  ;;  %v179_v39 = vshrl.u32 %v376_v31, %v178_v14  ;;  %v203_v40 = vsel %vm195_vm7, %v182_v30, %v185_v32 }
  0xae   :  { %v204_v42 = vsel %vm198_vm8, %v191_v36, 920167782  ;;  %v207_v43 = vsel %vm195_vm7, %v185_v32, %v188_v33  ;;  %v121_v44 = vadd.s32 536870912, %v120_v35  ;;  %vm196_vm10 = vcmp.lt.s32.totalorder %v176_v12, 2 }
  0xaf   :  { %v205_v41 = vsel %vm197_vm9, %v188_v33, %v204_v42  ;;  %v208_v45 = vsel %vm198_vm8, %v194_v37, 1326507024  ;;  %v199_v46 = vsel %vm195_vm7, %v179_v39, %v182_v30  ;;  %v201_v47 = vsel %vm197_vm9, %v185_v32, %v200_v38 }
  0xb0   :  { %v206_v48 = vsel %vm196_vm10, %v203_v40, %v205_v41  ;;  %v209_v49 = vsel %vm197_vm9, %v191_v36, %v208_v45  ;;  %v122_v50 = vshrl.u32 %v121_v44, 30  ;;  %v202_v56 = vsel %vm196_vm10, %v199_v46, %v201_v47 }
  0xb1   :  { %v210_v51 = vsel %vm196_vm10, %v207_v43, %v209_v49  ;;  %v462_v52 = vmul.u32.u64.low %v211_v15, %v206_v48  ;;  %v463_v53 = vmul.u32.u64.high %v211_v15, %v206_v48, %v462_v52  ;;  %v218_v59 = vmul.u32 %v211_v15, %v202_v56 }
  0xb2   :  { %v465_v54 = vmul.u32.u64.low %v211_v15, %v210_v51  ;;  %v466_v55 = vmul.u32.u64.high %v211_v15, %v210_v51, %v465_v54  ;;  %v123_v31 = vshll.u32 %v122_v50, 30  ;;  %v116_v10 = vadd.s32 %v451_v9, %v448_v8 }
  0xb3   :  { %v221_v58 = vadd.s32 1, %v463_v53  ;;  %v146_v39 = vsub.s32 4, %v122_v50  ;;  %vm492_vm1 = vcmp.le.f32.partialorder %v163_v24, 0.7853982  ;;  %v267_v54 = vand.u32 127, %v30_v0 }
  0xb4   :  { %v124_v57 = vsub.s32 %v120_v35, %v123_v31  ;;  %vm220_vm11 = vc.u32 %v466_v55, %v462_v52  ;;  %v219_v33 = vadd.s32 %v462_v52, %v466_v55  ;;  %vm152_vm6 = vweird.f32 %v424_v11 }
  0xb5   :  { %v222_v61 = vsel %vm220_vm11, %v221_v58, %v463_v53  ;;  %v147_v41 = vsel %vm62_vm14, %v146_v39, %v122_v50  ;;  %vm268_vm4 = vcmp.lt.s32.totalorder %v267_v54, 31  ;;  %vm271_vm7 = vcmask 261120  }
  0xb6   :  { %v126_v60 = vsub.s32 0, %v124_v57  ;;  %v223_v62 = vadd.s32 %v222_v61, %v218_v59  ;;  %v149_v13 = vsel %vm480_vm15, 0, %v147_v41  ;;  %vm255_vm11 = vweird.f32 %v428_v17 }
  0xb7   :  { %v153_v49 = vand.u32 3, %v149_v13 }
  0xb8   :  { %v294_v63 = vmin.u32 %v126_v60, %v124_v57  ;;  %v224_v1 = vadd.s32 536870912, %v223_v62 }
  0xb9   :  { %vm158_vm2 = vcmp.eq.s32.totalorder %v153_v49, 2  ;;  %vm155_vm3 = vcmp.eq.s32.totalorder %v153_v49, 0  ;;  %vm154_vm5 = vcmp.lt.s32.totalorder %v153_v49, 2 }
  0xba   :  { %v128_v2 = vclz %v294_v63  ;;  %v471_v3 = vshrl.u32 %v224_v1, 30 }
  0xbc   :  { %v295_v4 = vadd.s32 4294967294, %v128_v2  ;;  %v226_v5 = vshll.u32 %v471_v3, 30  ;;  %v249_v50 = vsub.s32 4, %v471_v3 }
  0xbe   :  { %vm296_vm12 = vcmp.lt.s32.totalorder %v295_v4, 0  ;;  %v227_v7 = vsub.s32 %v223_v62, %v226_v5  ;;  %v250_v58 = vsel %vm165_vm0, %v249_v50, %v471_v3 }
  0xbf   :  { %v131_v6 = vsel %vm296_vm12, 0, %v295_v4  ;;  %v252_v61 = vsel %vm492_vm1, 0, %v250_v58 }
  0xc0   :  { %v132_v12 = vsub.s32 32, %v131_v6  ;;  %v136_v14 = vsub.s32 4294967266, %v131_v6  ;;  %v229_v15 = vsub.s32 0, %v227_v7  ;;  %v133_v16 = vshll.u32 %v124_v57, %v131_v6 }
  0xc1   :  { %v256_v63 = vand.u32 3, %v252_v61 }
  0xc2   :  { %v134_v18 = vshrl.u32 %v116_v10, %v132_v12  ;;  %v137_v19 = vadd.s32 127, %v136_v14  ;;  %v298_v20 = vmin.u32 %v229_v15, %v227_v7 }
  0xc3   :  { %vm261_vm8 = vcmp.eq.s32.totalorder %v256_v63, 2  ;;  %vm258_vm9 = vcmp.eq.s32.totalorder %v256_v63, 0  ;;  %vm257_vm10 = vcmp.lt.s32.totalorder %v256_v63, 2 }
  0xc4   :  { %v135_v21 = vor.u32 %v134_v18, %v133_v16  ;;  %v138_v22 = vshll.u32 %v137_v19, 23  ;;  %v231_v23 = vclz %v298_v20 }
  0xc6   :  { %v139_v25 = vor.u32 4788187, %v138_v22  ;;  %v299_v26 = vadd.s32 4294967294, %v231_v23  ;;  %v142_v28 = vcvt.s32.f32 %v135_v21 }
  0xc8   :  { %v140_v27 = vand.u32 2147483647, %v139_v25  ;;  %vm300_vm13 = vcmp.lt.s32.totalorder %v299_v26, 0 }
  0xc9   :  { %v234_v32 = vsel %vm300_vm13, 0, %v299_v26 }
  0xca   :  { %v143_v30 = vmul.f32 %v142_v28, %v140_v27  ;;  %v235_v8 = vsub.s32 32, %v234_v32  ;;  %v239_v9 = vsub.s32 4294967266, %v234_v32  ;;  %v236_v29 = vshll.u32 %v227_v7, %v234_v32 }
  0xcc   :  { %v144_v34 = vxor.u32 2147483648, %v143_v30  ;;  %v237_v36 = vshrl.u32 %v219_v33, %v235_v8  ;;  %v240_v35 = vadd.s32 127, %v239_v9 }
  0xce   :  { %v145_v38 = vsel %vm62_vm14, %v144_v34, %v143_v30  ;;  %v238_v42 = vor.u32 %v237_v36, %v236_v29  ;;  %v241_v43 = vshll.u32 %v240_v35, 23 }
  0xcf   :  { %v148_v40 = vsel %vm480_vm15, %v424_v11, %v145_v38 }
  0xd0   :  { %319 = vcosq.f32 %v148_v40  ;;  %v242_v44 = vor.u32 4788187, %v241_v43  ;;  %v245_v46 = vcvt.s32.f32 %v238_v42 }
  0xd1   :  { %321 = vsinq.f32 %v148_v40 }
  0xd2   :  { %v243_v45 = vand.u32 2147483647, %v242_v44 }
  0xd4   :  { %v246_v47 = vmul.f32 %v245_v46, %v243_v45 }
  0xd6   :  { %v247_v48 = vxor.u32 2147483648, %v246_v47 }
  0xd8   :  { %v248_v52 = vsel %vm165_vm0, %v247_v48, %v246_v47 }
  0xd9   :  { %v251_v55 = vsel %vm492_vm1, %v428_v17, %v248_v52 }
  0xda   :  { %v320_v53 = vpop.eup %319  ;;  %323 = vcosq.f32 %v251_v55 }
  0xdb   :  { %v322_v31 = vpop.eup %321  ;;  %v159_v56 = vxor.u32 2147483648, %v320_v53  ;;  %325 = vsinq.f32 %v251_v55 }
  0xdc   :  { %v156_v24 = vxor.u32 2147483648, %v322_v31 }
  0xdd   :  { %v160_v57 = vsel %vm158_vm2, %v159_v56, %v322_v31 }
  0xde   :  { %v157_v59 = vsel %vm155_vm3, %v320_v53, %v156_v24 }
  0xdf   :  { %v161_v0 = vsel %vm154_vm5, %v157_v59, %v160_v57 }
  0xe0   :  { %v162_v60 = vsel %vm152_vm6, nan, %v161_v0 }
  0xe1   :  { %v269_v62 = vsel %vm268_vm4, %v162_v60, %v424_v11 }
  0xe2   :  { %272 = vst.msk [vmem:[#allocation5] sm:$0xff] %vm271_vm7, %v269_v62 }
  0xe4   :  { %v324_v1 = vpop.eup %323 }
  0xe5   :  { %v326_v2 = vpop.eup %325  ;;  %v262_v3 = vxor.u32 2147483648, %v324_v1 }
  0xe6   :  { %v259_v4 = vxor.u32 2147483648, %v326_v2 }
  0xe7   :  { %v263_v5 = vsel %vm261_vm8, %v262_v3, %v326_v2 }
  0xe8   :  { %v260_v6 = vsel %vm258_vm9, %v324_v1, %v259_v4 }
  0xe9   :  { %v264_v7 = vsel %vm257_vm10, %v260_v6, %v263_v5 }
  0xea   :  { %v265_v10 = vsel %vm255_vm11, nan, %v264_v7 }
  0xeb   :  { %v270_v11 = vsel %vm268_vm4, %v265_v10, %v428_v17 }
  0xec   :  { %273 = vst.msk [vmem:[#allocation5 + $0x8] sm:$0xff] %vm271_vm7, %v270_v11 }
  0xed   :  { %360 = shalt.err (!%p357_p12)
}
  0xee   :  { %s361_s30 = scalar_lea.hbm %s531_s3, 256 }
  0xef   :  { %p362_p13 = scmp.ne.s32.totalorder %s531_s3, %s361_s30  ;;  %p365_p0 = scmp.lt.u32.totalorder %s361_s30, %s531_s3 }
  0xf1   :  { %p367_p1 = pnand %p365_p0, %p362_p13 }
  0xf3   :  { %370 = shalt.err (!%p367_p1)
}
  0xf4   :  { %s383_s8 = smov 128   ;;  %s384_s9 = smov 8  }
  0xf5   :  { %285 = dma.vmem_to_hbm [thread:$0]  %s280_s1, 256, %s531_s3, [#allocation4], %s383_s8, %s383_s8, %s384_s9  }
  0xf6   :  { %373 = dma.done.wait [#allocation4], 256  }
  0xf7   :  { %374 = vsyncadd [#allocation4], 4294967040 }
  0xf8   :  { %289 = vsyncpa [#allocation3], 1 }
  0xf9   :  { %290 = vsyncpa [#allocation4], 1 }

</bundles_post_ra>
